<compile_context>
chip_gen: v7x
topology: tpu7x:2x2x1
jax: 0.10.0
libtpu: 0.0.40
codegen_flags: <defaults>
</compile_context>

<pallas_src>
import functools
import math

import jax
import jax.numpy as jnp
from jax import lax
from jax.experimental import pallas as pl
from jax.experimental.pallas import tpu as pltpu

_LN_EPS = 1e-5


# ---------------------------------------------------------------------------
# Small helpers
# ---------------------------------------------------------------------------
def _round_up(n, m):
    return ((n + m - 1) // m) * m


def _pick_tile(total, candidates):
    for c in candidates:
        if c <= total and total % c == 0:
            return c
    return None


def _vmem_capacity():
    try:
        return int(pltpu.get_tpu_info().vmem_capacity_bytes)
    except Exception:
        return 64 << 20          # conservative fallback (v7x per-TensorCore VMEM)


def _vmem_limit(need_bytes, cap):
    # need + small headroom, clamped to [32 MiB, capacity - 8 MiB].
    hi = max(cap - (8 << 20), 32 << 20)
    return int(min(max(int(need_bytes) + (4 << 20), 32 << 20), hi))


def _layer_norm_f32(x, gamma, beta):
    mean = jnp.mean(x, axis=-1, keepdims=True)
    var = jnp.mean(jnp.square(x - mean), axis=-1, keepdims=True)
    return (x - mean) * lax.rsqrt(var + _LN_EPS) * gamma + beta


def _gelu_f32(h, approx):
    if approx:
        # tanh-approximate GELU: routes to the EUP instead of a long erf VPU polynomial.
        c = math.sqrt(2.0 / math.pi)
        return 0.5 * h * (1.0 + jnp.tanh(c * (h + 0.044715 * h * h * h)))
    # Exact GELU (PyTorch nn.GELU default).
    return 0.5 * h * (1.0 + lax.erf(h * (1.0 / math.sqrt(2.0))))


# ---------------------------------------------------------------------------
# Kernel 1: residual + causal multi-head attention over LayerNorm1(x)
#   grid = (B, n_q_tiles); QKV projected once per batch element at qi==0 into
#   head-major VMEM caches; each q-tile does head-batched attention.
# ---------------------------------------------------------------------------
def _attn_block_kernel(x_ref, g_ref, b_ref, wqkv_ref, bqkv_ref, o_ref,
                       qc_ref, kc_ref, vc_ref,
                       *, n_head, d_model, tq, compute_dtype):
    D = d_model
    dh = D // n_head
    T = x_ref.shape[0]
    qi = pl.program_id(1)

    @pl.when(qi == 0)
    def _():
        # One-time (per batch element) LN + QKV projection + head-major cache fill.
        xf = x_ref[...].astype(jnp.float32)                          # (T, D)
        xn = _layer_norm_f32(xf, g_ref[...].astype(jnp.float32),
                             b_ref[...].astype(jnp.float32))
        qkv = jnp.dot(xn.astype(compute_dtype), wqkv_ref[...],
                      preferred_element_type=jnp.float32)
        qkv = qkv + bqkv_ref[...].astype(jnp.float32)                # (T, 3D)
        scale = 1.0 / math.sqrt(dh)                                  # folded into Q
        for h in range(n_head):
            lo = h * dh
            qc_ref[h] = (qkv[:, lo:lo + dh] * scale).astype(compute_dtype)
            kc_ref[h] = qkv[:, D + lo:D + lo + dh].astype(compute_dtype)
            vc_ref[h] = qkv[:, 2 * D + lo:2 * D + lo + dh].astype(compute_dtype)

    start = pl.multiple_of(qi * tq, tq)
    if tq == T:                                       # static: single q tile
        qh = qc_ref[...]                              # (n_head, T, dh)
        x_rows = x_ref[...].astype(jnp.float32)       # (T, D)
    else:
        qh = qc_ref[:, pl.ds(start, tq), :]           # (n_head, tq, dh)
        x_rows = x_ref[pl.ds(start, tq), :].astype(jnp.float32)

    # Head-batched QK^T (scale already folded into Q).
    att = jnp.einsum('hqd,hkd->hqk', qh, kc_ref[...],
                     preferred_element_type=jnp.float32)             # (n_head, tq, T)

    row = start + lax.broadcasted_iota(jnp.int32, att.shape, 1)
    col = lax.broadcasted_iota(jnp.int32, att.shape, 2)
    att = jnp.where(row >= col, att, -jnp.inf)

    att = att - jnp.max(att, axis=-1, keepdims=True)
    p = jnp.exp(att)
    p = p * pl.reciprocal(jnp.sum(p, axis=-1, keepdims=True), approx=True)

    y = jnp.einsum('hqk,hkd->hqd', p.astype(compute_dtype), vc_ref[...],
                   preferred_element_type=jnp.float32)               # (n_head, tq, dh)
    y2d = jnp.concatenate([y[h] for h in range(n_head)], axis=-1)    # (tq, D)

    o_ref[...] = (x_rows + y2d).astype(o_ref.dtype)                  # fused residual


def attention_residual(x, gamma, beta, wqkv, bqkv, *, n_head, compute_dtype,
                       q_block=None):
    """Returns x + Attention(LayerNorm(x)). x: [B,T,D]; wqkv: [D,3D] (x @ W layout)."""
    B, T, D = x.shape
    assert D % n_head == 0
    dh = D // n_head

    tq = q_block or (_pick_tile(T, (256, 128, 64, 32, 16, 8)) or T)
    if T % tq != 0:
        tq = T
    n_q = T // tq

    wqkv_c = wqkv.astype(compute_dtype)
    bqkv_2 = bqkv.reshape(1, 3 * D)
    g2 = gamma.reshape(1, D)
    be2 = beta.reshape(1, D)

    w_item = jnp.dtype(compute_dtype).itemsize
    cap = _vmem_capacity()
    dh_pad = max(dh, 128)                            # lane padding of head-major caches
    need = (2 * T * D * x.dtype.itemsize             # x block (double-buffered)
            + 2 * tq * D * x.dtype.itemsize          # out blocks
            + D * 3 * D * w_item                     # W_qkv (single-buffered)
            + 3 * n_head * T * dh_pad * w_item       # q/k/v caches (lane-padded)
            + T * 3 * D * 4                          # qkv f32 intermediate at qi==0
            + 3 * n_head * tq * T * 4                # scores / probs / mask temporaries
            + 2 * tq * D * 4)                        # per-tile output assembly
    cost = pl.CostEstimate(
        flops=int(B * (6 * T * D * D + 4 * n_head * T * T * dh)),
        transcendentals=int(B * n_head * T * T),
        bytes_accessed=int(2 * x.size * x.dtype.itemsize + wqkv_c.size * w_item),
    )

    kernel = functools.partial(_attn_block_kernel, n_head=n_head, d_model=D,
                               tq=tq, compute_dtype=compute_dtype)
    # TODO(synk): for very long sequences, split the QKV projection into its own kernel
    # and run a true flash grid (parallel q tiles + online softmax over kv tiles) so the
    # K/V caches and scores never exceed a fixed VMEM budget.
    return pl.pallas_call(
        kernel,
        out_shape=jax.ShapeDtypeStruct((B, T, D), x.dtype),
        grid_spec=pltpu.PrefetchScalarGridSpec(
            num_scalar_prefetch=0,
            grid=(B, n_q),
            in_specs=[
                pl.BlockSpec((None, T, D), lambda b, q: (b, 0, 0)),     # activations
                pl.BlockSpec((1, D), lambda b, q: (0, 0),
                             pipeline_mode=pl.Buffered(1)),             # ln1 gamma
                pl.BlockSpec((1, D), lambda b, q: (0, 0),
                             pipeline_mode=pl.Buffered(1)),             # ln1 beta
                pl.BlockSpec((D, 3 * D), lambda b, q: (0, 0),
                             pipeline_mode=pl.Buffered(1)),             # W_qkv resident
                pl.BlockSpec((1, 3 * D), lambda b, q: (0, 0),
                             pipeline_mode=pl.Buffered(1)),             # b_qkv
            ],
            out_specs=pl.BlockSpec((None, tq, D), lambda b, q: (b, q, 0)),
            scratch_shapes=[
                pltpu.VMEM((n_head, T, dh), compute_dtype),   # Q cache (pre-scaled)
                pltpu.VMEM((n_head, T, dh), compute_dtype),   # K cache
                pltpu.VMEM((n_head, T, dh), compute_dtype),   # V cache
            ],
        ),
        compiler_params=pltpu.CompilerParams(
            dimension_semantics=("parallel", "arbitrary"),
            vmem_limit_bytes=_vmem_limit(need, cap),
        ),
        cost_estimate=cost,
    )(x, g2, be2, wqkv_c, bqkv_2)


# ---------------------------------------------------------------------------
# Kernel 2: residual + FFN over LayerNorm2(x)
#   resident-weight variant and H-streaming variant (for large D / v7x VMEM)
# ---------------------------------------------------------------------------
def _ffn_resident_kernel(x_ref, g_ref, b_ref, w1_ref, b1_ref, w2_ref, b2_ref,
                         o_ref, *, compute_dtype, gelu_approx):
    x = x_ref[...].astype(jnp.float32)                     # (tm, D)
    xn = _layer_norm_f32(x, g_ref[...].astype(jnp.float32),
                         b_ref[...].astype(jnp.float32))
    h = jnp.dot(xn.astype(compute_dtype), w1_ref[...],
                preferred_element_type=jnp.float32)
    h = h + b1_ref[...].astype(jnp.float32)
    h = _gelu_f32(h, gelu_approx)
    y = jnp.dot(h.astype(compute_dtype), w2_ref[...],
                preferred_element_type=jnp.float32)
    y = y + b2_ref[...].astype(jnp.float32)
    o_ref[...] = (x + y).astype(o_ref.dtype)               # fused residual add


def _ffn_stream_kernel(x_ref, g_ref, b_ref, w1_ref, b1_ref, w2_ref, b2_ref,
                       o_ref, xn_ref, acc_ref, *, compute_dtype, gelu_approx):
    j = pl.program_id(1)

    @pl.when(j == 0)
    def _():
        x = x_ref[...].astype(jnp.float32)
        xn = _layer_norm_f32(x, g_ref[...].astype(jnp.float32),
                             b_ref[...].astype(jnp.float32))
        xn_ref[...] = xn.astype(compute_dtype)
        acc_ref[...] = jnp.zeros_like(acc_ref)

    h = jnp.dot(xn_ref[...], w1_ref[...], preferred_element_type=jnp.float32)
    h = h + b1_ref[...].astype(jnp.float32)
    h = _gelu_f32(h, gelu_approx)
    acc_ref[...] += jnp.dot(h.astype(compute_dtype), w2_ref[...],
                            preferred_element_type=jnp.float32)

    @pl.when(j == pl.num_programs(1) - 1)
    def _():
        x = x_ref[...].astype(jnp.float32)
        y = acc_ref[...] + b2_ref[...].astype(jnp.float32)
        o_ref[...] = (x + y).astype(o_ref.dtype)


def ffn_residual(x, gamma, beta, w1, b1, w2, b2, *, compute_dtype,
                 gelu_approx=False, h_block=None, tm=None):
    """Returns x + FFN(LayerNorm(x)). x: [B,T,D]; w1: [D,4D]; w2: [4D,D]."""
    B, T, D = x.shape
    H = w1.shape[1]
    M = B * T

    if tm is None:
        tm = _pick_tile(M, (256, 128, 64, 32, 16, 8))
        if tm is None:
            tm = M if M <= 1024 else 256
    pad = (-M) % tm
    # TODO(synk): handle a ragged tail with an in-kernel masked store instead of padding.
    x2 = x.reshape(M, D)
    if pad:
        x2 = jnp.pad(x2, ((0, pad), (0, 0)))
    M_pad = M + pad

    w_item = jnp.dtype(compute_dtype).itemsize
    cap = _vmem_capacity()

    w1_c = w1.astype(compute_dtype)
    w2_c = w2.astype(compute_dtype)
    b1_2 = b1.reshape(1, H)
    b2_2 = b2.reshape(1, D)
    g2 = gamma.reshape(1, D)
    be2 = beta.reshape(1, D)

    resident_need = (4 * tm * D * x.dtype.itemsize       # in/out tiles (double-buffered)
                     + 2 * D * H * w_item                # resident W1+W2 (single-buffered)
                     + 2 * tm * H * 4                    # f32 hidden (pre/post GELU)
                     + 2 * tm * D * 4)                   # xn / y f32
    use_stream = (h_block is not None) or (resident_need > int(0.7 * cap))

    out_shape = jax.ShapeDtypeStruct((M_pad, D), x.dtype)
    cost = pl.CostEstimate(
        flops=int(4 * M_pad * D * H),
        transcendentals=int(M_pad * H),
        bytes_accessed=int(2 * M_pad * D * x.dtype.itemsize + 2 * D * H * w_item),
    )

    if not use_stream:
        kernel = functools.partial(_ffn_resident_kernel, compute_dtype=compute_dtype,
                                   gelu_approx=gelu_approx)
        out2 = pl.pallas_call(
            kernel,
            out_shape=out_shape,
            grid_spec=pltpu.PrefetchScalarGridSpec(
                num_scalar_prefetch=0,
                grid=(M_pad // tm,),
                in_specs=[
                    pl.BlockSpec((tm, D), lambda i: (i, 0)),               # activation tile
                    pl.BlockSpec((1, D), lambda i: (0, 0),
                                 pipeline_mode=pl.Buffered(1)),            # ln2 gamma
                    pl.BlockSpec((1, D), lambda i: (0, 0),
                                 pipeline_mode=pl.Buffered(1)),            # ln2 beta
                    pl.BlockSpec((D, H), lambda i: (0, 0),
                                 pipeline_mode=pl.Buffered(1)),            # W1 resident
                    pl.BlockSpec((1, H), lambda i: (0, 0),
                                 pipeline_mode=pl.Buffered(1)),            # b1
                    pl.BlockSpec((H, D), lambda i: (0, 0),
                                 pipeline_mode=pl.Buffered(1)),            # W2 resident
                    pl.BlockSpec((1, D), lambda i: (0, 0),
                                 pipeline_mode=pl.Buffered(1)),            # b2
                ],
                out_specs=pl.BlockSpec((tm, D), lambda i: (i, 0)),
            ),
            compiler_params=pltpu.CompilerParams(
                dimension_semantics=("parallel",),
                vmem_limit_bytes=_vmem_limit(resident_need, cap)),
            cost_estimate=cost,
        )(x2, g2, be2, w1_c, b1_2, w2_c, b2_2)
    else:
        th = h_block if h_block is not None else \
            (_pick_tile(H, (2048, 1024, 512, 256, 128)) or H)
        if H % th != 0:
            th = _pick_tile(H, (2048, 1024, 512, 256, 128)) or H
        stream_need = (4 * tm * D * x.dtype.itemsize
                       + 4 * D * th * w_item             # W1/W2 H-blocks, double-buffered
                       + 2 * tm * th * 4                 # f32 hidden slab
                       + tm * D * (w_item + 4))          # xn cache + f32 accumulator
        kernel = functools.partial(_ffn_stream_kernel, compute_dtype=compute_dtype,
                                   gelu_approx=gelu_approx)
        out2 = pl.pallas_call(
            kernel,
            out_shape=out_shape,
            grid_spec=pltpu.PrefetchScalarGridSpec(
                num_scalar_prefetch=0,
                grid=(M_pad // tm, H // th),
                in_specs=[
                    pl.BlockSpec((tm, D), lambda i, j: (i, 0)),
                    pl.BlockSpec((1, D), lambda i, j: (0, 0),
                                 pipeline_mode=pl.Buffered(1)),
                    pl.BlockSpec((1, D), lambda i, j: (0, 0),
                                 pipeline_mode=pl.Buffered(1)),
                    pl.BlockSpec((D, th), lambda i, j: (0, j)),            # W1 H-block
                    pl.BlockSpec((1, th), lambda i, j: (0, j)),            # b1 H-block
                    pl.BlockSpec((th, D), lambda i, j: (j, 0)),            # W2 H-block
                    pl.BlockSpec((1, D), lambda i, j: (0, 0),
                                 pipeline_mode=pl.Buffered(1)),
                ],
                out_specs=pl.BlockSpec((tm, D), lambda i, j: (i, 0)),
                scratch_shapes=[pltpu.VMEM((tm, D), compute_dtype),   # LayerNorm(x) cache
                                pltpu.VMEM((tm, D), jnp.float32)],    # f32 accumulator
            ),
            compiler_params=pltpu.CompilerParams(
                dimension_semantics=("parallel", "arbitrary"),
                vmem_limit_bytes=_vmem_limit(stream_need, cap)),
            cost_estimate=cost,
        )(x2, g2, be2, w1_c, b1_2, w2_c, b2_2)

    if pad:
        out2 = out2[:M]
    return out2.reshape(B, T, D)


# ---------------------------------------------------------------------------
# Block forward, parameter init, pure-JAX reference
# ---------------------------------------------------------------------------
def block_forward(x, params, *, n_head, compute_dtype=None, gelu_approx=False,
                  ffn_h_block=None, attn_q_block=None):
    """Full Block: x + Attn(LN1(x)); then + FFN(LN2(.))."""
    if compute_dtype is None:
        # bf16 MXU operands with f32 accumulation by default; f32 kept as debug mode.
        compute_dtype = jnp.bfloat16 if x.dtype == jnp.float32 else x.dtype
    # TODO(synk): add input_output_aliases / fuse the attention epilogue with the FFN
    # LayerNorm once callers guarantee the input is dead after the call (saves one
    # [B,T,D] HBM round trip; biggest win on v5e).
    x = attention_residual(x, params["ln1_g"], params["ln1_b"],
                           params["wqkv"], params["bqkv"],
                           n_head=n_head, compute_dtype=compute_dtype,
                           q_block=attn_q_block)
    x = ffn_residual(x, params["ln2_g"], params["ln2_b"],
                     params["w1"], params["b1"], params["w2"], params["b2"],
                     compute_dtype=compute_dtype, gelu_approx=gelu_approx,
                     h_block=ffn_h_block)
    return x


def init_block_params(key, n_embd, n_layer, dtype=jnp.float32):
    """Matches torch defaults: Linear U(-1/sqrt(fan_in), ..), LayerNorm (1, 0), and
    the 1/sqrt(n_layer*2) weight rescale from the module __init__ (biases untouched).
    Weights stored pre-transposed as [in, out]."""
    D = n_embd
    H = 4 * D
    k = jax.random.split(key, 6)
    rescale = 1.0 / math.sqrt(n_layer * 2)

    lim_a = 1.0 / math.sqrt(D)
    wqkv = jax.random.uniform(k[0], (D, 3 * D), dtype, -lim_a, lim_a) * rescale
    bqkv = jax.random.uniform(k[1], (3 * D,), dtype, -lim_a, lim_a)

    lim1 = 1.0 / math.sqrt(D)
    w1 = jax.random.uniform(k[2], (D, H), dtype, -lim1, lim1) * rescale
    b1 = jax.random.uniform(k[3], (H,), dtype, -lim1, lim1)
    lim2 = 1.0 / math.sqrt(H)
    w2 = jax.random.uniform(k[4], (H, D), dtype, -lim2, lim2) * rescale
    b2 = jax.random.uniform(k[5], (D,), dtype, -lim2, lim2)

    return dict(
        ln1_g=jnp.ones((D,), dtype), ln1_b=jnp.zeros((D,), dtype),
        ln2_g=jnp.ones((D,), dtype), ln2_b=jnp.zeros((D,), dtype),
        wqkv=wqkv, bqkv=bqkv, w1=w1, b1=b1, w2=w2, b2=b2,
    )


def block_reference(x, params, *, n_head):
    B, T, D = x.shape
    dh = D // n_head

    def ln(v, g, b):
        mean = jnp.mean(v, axis=-1, keepdims=True)
        var = jnp.mean(jnp.square(v - mean), axis=-1, keepdims=True)
        return (v - mean) / jnp.sqrt(var + _LN_EPS) * g + b

    xn = ln(x, params["ln1_g"], params["ln1_b"])
    qkv = xn @ params["wqkv"] + params["bqkv"]
    q, k, v = jnp.split(qkv, 3, axis=-1)
    q = q.reshape(B, T, n_head, dh).transpose(0, 2, 1, 3)
    k = k.reshape(B, T, n_head, dh).transpose(0, 2, 1, 3)
    v = v.reshape(B, T, n_head, dh).transpose(0, 2, 1, 3)
    att = q @ jnp.swapaxes(k, -1, -2) / math.sqrt(dh)
    mask = jnp.tril(jnp.ones((T, T), bool))
    att = jnp.where(mask, att, -jnp.inf)
    att = jax.nn.softmax(att, axis=-1)
    y = (att @ v).transpose(0, 2, 1, 3).reshape(B, T, D)
    x = x + y

    xn2 = ln(x, params["ln2_g"], params["ln2_b"])
    h = xn2 @ params["w1"] + params["b1"]
    h = 0.5 * h * (1.0 + lax.erf(h / math.sqrt(2.0)))
    return x + (h @ params["w2"] + params["b2"])


if __name__ == "__main__":
    config = {"n_embd": 32, "n_head": 4, "n_layer": 4}
    B, T = 2, 8

    key = jax.random.PRNGKey(0)
    kx, kp = jax.random.split(key)
    x = jax.random.normal(kx, (B, T, config["n_embd"]), jnp.float32)
    params = init_block_params(kp, config["n_embd"], config["n_layer"])
    ref = block_reference(x, params, n_head=config["n_head"])

    # Default path: bf16 MXU operands, f32 accumulation.
    out = block_forward(x, params, n_head=config["n_head"])
    jax.block_until_ready(out)
    assert out.shape == ref.shape and out.dtype == ref.dtype
    err = float(jnp.max(jnp.abs(out - ref)))
    assert jnp.allclose(out, ref, atol=1e-1, rtol=1e-1), err

    # f32 debug/reference path — tight comparison against the pure-JAX reference.
    out_f32 = block_forward(x, params, n_head=config["n_head"],
                            compute_dtype=jnp.float32)
    jax.block_until_ready(out_f32)
    err32 = float(jnp.max(jnp.abs(out_f32 - ref)))
    assert jnp.allclose(out_f32, ref, atol=1e-2, rtol=1e-2), err32

    # Exercise the H-streaming FFN path (v7x-targeted) and tanh-approximate GELU
    # at a slightly larger embedding so H=256 splits into two 128-wide blocks.
    config2 = {"n_embd": 64, "n_head": 4, "n_layer": 4}
    x2 = jax.random.normal(jax.random.PRNGKey(1), (B, T, config2["n_embd"]), jnp.float32)
    params2 = init_block_params(jax.random.PRNGKey(2), config2["n_embd"],
                                config2["n_layer"])
    ref2 = block_reference(x2, params2, n_head=config2["n_head"])
    out2 = block_forward(x2, params2, n_head=config2["n_head"],
                         ffn_h_block=128, gelu_approx=True)
    jax.block_until_ready(out2)
    err2 = float(jnp.max(jnp.abs(out2 - ref2)))
    assert jnp.allclose(out2, ref2, atol=1e-1, rtol=1e-1), err2

    print("KERNEL_OK")
</pallas_src>

<mosaic_0001>
module attributes {stable_mosaic.version = 11 : i64} {
  func.func @_attn_block_kernel(%arg0: i32, %arg1: i32, %arg2: memref<1x8x32xf32, #tpu.memory_space<vmem>>, %arg3: memref<1x32xf32, #tpu.memory_space<vmem>>, %arg4: memref<1x32xf32, #tpu.memory_space<vmem>>, %arg5: memref<32x96xbf16, #tpu.memory_space<vmem>>, %arg6: memref<1x96xf32, #tpu.memory_space<vmem>>, %arg7: memref<1x8x32xf32, #tpu.memory_space<vmem>>, %arg8: memref<4x8x8xbf16, #tpu.memory_space<vmem>>, %arg9: memref<4x8x8xbf16, #tpu.memory_space<vmem>>, %arg10: memref<4x8x8xbf16, #tpu.memory_space<vmem>>) attributes {dimension_semantics = [#tpu.dimension_semantics<parallel>, #tpu.dimension_semantics<arbitrary>], iteration_bounds = array<i64: 2, 1>, scalar_prefetch = 0 : i64, scratch_operands = 3 : i64, tpu.core_type = #tpu.core_type<tc>, window_params = [{transform_indices = @transform_0, window_bounds = array<i64: 1, 8, 32>}, {pipeline_mode = #tpu.pipeline_mode<synchronous>, transform_indices = @transform_1, window_bounds = array<i64: 1, 32>}, {pipeline_mode = #tpu.pipeline_mode<synchronous>, transform_indices = @transform_2, window_bounds = array<i64: 1, 32>}, {pipeline_mode = #tpu.pipeline_mode<synchronous>, transform_indices = @transform_3, window_bounds = array<i64: 32, 96>}, {pipeline_mode = #tpu.pipeline_mode<synchronous>, transform_indices = @transform_4, window_bounds = array<i64: 1, 96>}, {transform_indices = @transform_5, window_bounds = array<i64: 1, 8, 32>}]} {
    %c0_i32 = arith.constant 0 : i32
    %0 = arith.cmpi eq, %arg1, %c0_i32 : i32
    %1 = arith.extui %0 : i1 to i32
    %c0_i32_0 = arith.constant 0 : i32
    %2 = arith.cmpi ne, %1, %c0_i32_0 : i32
    scf.if %2 {
      %c0_19 = arith.constant 0 : index
      %c0_20 = arith.constant 0 : index
      %c0_21 = arith.constant 0 : index
      %43 = vector.load %arg2[%c0_19, %c0_20, %c0_21] : memref<1x8x32xf32, #tpu.memory_space<vmem>>, vector<1x8x32xf32>
      %44 = vector.shape_cast %43 : vector<1x8x32xf32> to vector<8x32xf32>
      %c0_22 = arith.constant 0 : index
      %c0_23 = arith.constant 0 : index
      %45 = vector.load %arg3[%c0_22, %c0_23] : memref<1x32xf32, #tpu.memory_space<vmem>>, vector<1x32xf32>
      %c0_24 = arith.constant 0 : index
      %c0_25 = arith.constant 0 : index
      %46 = vector.load %arg4[%c0_24, %c0_25] : memref<1x32xf32, #tpu.memory_space<vmem>>, vector<1x32xf32>
      %cst_26 = arith.constant dense<0.000000e+00> : vector<8xf32>
      %47 = vector.multi_reduction <add>, %44, %cst_26 [1] : vector<8x32xf32> to vector<8xf32>
      %48 = vector.shape_cast %47 : vector<8xf32> to vector<8x1xf32>
      %cst_27 = arith.constant 3.200000e+01 : f32
      %49 = vector.broadcast %cst_27 : f32 to vector<8x1xf32>
      %50 = arith.divf %48, %49 : vector<8x1xf32>
      %51 = vector.broadcast %50 : vector<8x1xf32> to vector<8x32xf32>
      %52 = arith.subf %44, %51 : vector<8x32xf32>
      %53 = arith.mulf %52, %52 : vector<8x32xf32>
      %cst_28 = arith.constant dense<0.000000e+00> : vector<8xf32>
      %54 = vector.multi_reduction <add>, %53, %cst_28 [1] : vector<8x32xf32> to vector<8xf32>
      %55 = vector.shape_cast %54 : vector<8xf32> to vector<8x1xf32>
      %cst_29 = arith.constant 3.200000e+01 : f32
      %56 = vector.broadcast %cst_29 : f32 to vector<8x1xf32>
      %57 = arith.divf %55, %56 : vector<8x1xf32>
      %58 = vector.broadcast %50 : vector<8x1xf32> to vector<8x32xf32>
      %59 = arith.subf %44, %58 : vector<8x32xf32>
      %cst_30 = arith.constant 9.99999974E-6 : f32
      %60 = vector.broadcast %cst_30 : f32 to vector<8x1xf32>
      %61 = arith.addf %57, %60 : vector<8x1xf32>
      %62 = math.rsqrt %61 : vector<8x1xf32>
      %63 = vector.broadcast %62 : vector<8x1xf32> to vector<8x32xf32>
      %64 = arith.mulf %59, %63 : vector<8x32xf32>
      %65 = vector.broadcast %45 : vector<1x32xf32> to vector<8x32xf32>
      %66 = arith.mulf %64, %65 : vector<8x32xf32>
      %67 = vector.broadcast %46 : vector<1x32xf32> to vector<8x32xf32>
      %68 = arith.addf %66, %67 : vector<8x32xf32>
      %69 = arith.truncf %68 : vector<8x32xf32> to vector<8x32xbf16>
      %c0_31 = arith.constant 0 : index
      %c0_32 = arith.constant 0 : index
      %70 = vector.load %arg5[%c0_31, %c0_32] : memref<32x96xbf16, #tpu.memory_space<vmem>>, vector<32x96xbf16>
      %cst_33 = arith.constant dense<0.000000e+00> : vector<8x96xf32>
      %71 = tpu.matmul %69, %70, %cst_33 {dimension_numbers = #tpu.dot_dimension_numbers<[1], [0], [0], [1], [0, 0, 1, 1], [], []>} : vector<8x32xbf16>, vector<32x96xbf16>, vector<8x96xf32> -> vector<8x96xf32>
      %c0_34 = arith.constant 0 : index
      %c0_35 = arith.constant 0 : index
      %72 = vector.load %arg6[%c0_34, %c0_35] : memref<1x96xf32, #tpu.memory_space<vmem>>, vector<1x96xf32>
      %73 = vector.broadcast %72 : vector<1x96xf32> to vector<8x96xf32>
      %74 = arith.addf %71, %73 : vector<8x96xf32>
      %75 = vector.extract_strided_slice %74 {offsets = [0, 0], sizes = [8, 8], strides = [1, 1]} : vector<8x96xf32> to vector<8x8xf32>
      %cst_36 = arith.constant 0.353553385 : f32
      %76 = vector.broadcast %cst_36 : f32 to vector<8x8xf32>
      %77 = arith.mulf %75, %76 : vector<8x8xf32>
      %78 = arith.truncf %77 : vector<8x8xf32> to vector<8x8xbf16>
      %c0_37 = arith.constant 0 : index
      %c0_38 = arith.constant 0 : index
      %c0_39 = arith.constant 0 : index
      %79 = vector.load %arg8[%c0_37, %c0_38, %c0_39] : memref<4x8x8xbf16, #tpu.memory_space<vmem>>, vector<1x8x8xbf16>
      %80 = vector.shape_cast %79 : vector<1x8x8xbf16> to vector<8x8xbf16>
      %81 = vector.shape_cast %78 : vector<8x8xbf16> to vector<1x8x8xbf16>
      tpu.vector_store %arg8[%c0_37, %c0_38, %c0_39], %81 {strides = array<i32>} : memref<4x8x8xbf16, #tpu.memory_space<vmem>>, vector<1x8x8xbf16>,
      %82 = vector.extract_strided_slice %74 {offsets = [0, 32], sizes = [8, 8], strides = [1, 1]} : vector<8x96xf32> to vector<8x8xf32>
      %83 = arith.truncf %82 : vector<8x8xf32> to vector<8x8xbf16>
      %c0_40 = arith.constant 0 : index
      %c0_41 = arith.constant 0 : index
      %c0_42 = arith.constant 0 : index
      %84 = vector.load %arg9[%c0_40, %c0_41, %c0_42] : memref<4x8x8xbf16, #tpu.memory_space<vmem>>, vector<1x8x8xbf16>
      %85 = vector.shape_cast %84 : vector<1x8x8xbf16> to vector<8x8xbf16>
      %86 = vector.shape_cast %83 : vector<8x8xbf16> to vector<1x8x8xbf16>
      tpu.vector_store %arg9[%c0_40, %c0_41, %c0_42], %86 {strides = array<i32>} : memref<4x8x8xbf16, #tpu.memory_space<vmem>>, vector<1x8x8xbf16>,
      %87 = vector.extract_strided_slice %74 {offsets = [0, 64], sizes = [8, 8], strides = [1, 1]} : vector<8x96xf32> to vector<8x8xf32>
      %88 = arith.truncf %87 : vector<8x8xf32> to vector<8x8xbf16>
      %c0_43 = arith.constant 0 : index
      %c0_44 = arith.constant 0 : index
      %c0_45 = arith.constant 0 : index
      %89 = vector.load %arg10[%c0_43, %c0_44, %c0_45] : memref<4x8x8xbf16, #tpu.memory_space<vmem>>, vector<1x8x8xbf16>
      %90 = vector.shape_cast %89 : vector<1x8x8xbf16> to vector<8x8xbf16>
      %91 = vector.shape_cast %88 : vector<8x8xbf16> to vector<1x8x8xbf16>
      tpu.vector_store %arg10[%c0_43, %c0_44, %c0_45], %91 {strides = array<i32>} : memref<4x8x8xbf16, #tpu.memory_space<vmem>>, vector<1x8x8xbf16>,
      %92 = vector.extract_strided_slice %74 {offsets = [0, 8], sizes = [8, 8], strides = [1, 1]} : vector<8x96xf32> to vector<8x8xf32>
      %cst_46 = arith.constant 0.353553385 : f32
      %93 = vector.broadcast %cst_46 : f32 to vector<8x8xf32>
      %94 = arith.mulf %92, %93 : vector<8x8xf32>
      %95 = arith.truncf %94 : vector<8x8xf32> to vector<8x8xbf16>
      %c1 = arith.constant 1 : index
      %c0_47 = arith.constant 0 : index
      %c0_48 = arith.constant 0 : index
      %96 = vector.load %arg8[%c1, %c0_47, %c0_48] : memref<4x8x8xbf16, #tpu.memory_space<vmem>>, vector<1x8x8xbf16>
      %97 = vector.shape_cast %96 : vector<1x8x8xbf16> to vector<8x8xbf16>
      %98 = vector.shape_cast %95 : vector<8x8xbf16> to vector<1x8x8xbf16>
      tpu.vector_store %arg8[%c1, %c0_47, %c0_48], %98 {strides = array<i32>} : memref<4x8x8xbf16, #tpu.memory_space<vmem>>, vector<1x8x8xbf16>,
      %99 = vector.extract_strided_slice %74 {offsets = [0, 40], sizes = [8, 8], strides = [1, 1]} : vector<8x96xf32> to vector<8x8xf32>
      %100 = arith.truncf %99 : vector<8x8xf32> to vector<8x8xbf16>
      %c1_49 = arith.constant 1 : index
      %c0_50 = arith.constant 0 : index
      %c0_51 = arith.constant 0 : index
      %101 = vector.load %arg9[%c1_49, %c0_50, %c0_51] : memref<4x8x8xbf16, #tpu.memory_space<vmem>>, vector<1x8x8xbf16>
      %102 = vector.shape_cast %101 : vector<1x8x8xbf16> to vector<8x8xbf16>
      %103 = vector.shape_cast %100 : vector<8x8xbf16> to vector<1x8x8xbf16>
      tpu.vector_store %arg9[%c1_49, %c0_50, %c0_51], %103 {strides = array<i32>} : memref<4x8x8xbf16, #tpu.memory_space<vmem>>, vector<1x8x8xbf16>,
      %104 = vector.extract_strided_slice %74 {offsets = [0, 72], sizes = [8, 8], strides = [1, 1]} : vector<8x96xf32> to vector<8x8xf32>
      %105 = arith.truncf %104 : vector<8x8xf32> to vector<8x8xbf16>
      %c1_52 = arith.constant 1 : index
      %c0_53 = arith.constant 0 : index
      %c0_54 = arith.constant 0 : index
      %106 = vector.load %arg10[%c1_52, %c0_53, %c0_54] : memref<4x8x8xbf16, #tpu.memory_space<vmem>>, vector<1x8x8xbf16>
      %107 = vector.shape_cast %106 : vector<1x8x8xbf16> to vector<8x8xbf16>
      %108 = vector.shape_cast %105 : vector<8x8xbf16> to vector<1x8x8xbf16>
      tpu.vector_store %arg10[%c1_52, %c0_53, %c0_54], %108 {strides = array<i32>} : memref<4x8x8xbf16, #tpu.memory_space<vmem>>, vector<1x8x8xbf16>,
      %109 = vector.extract_strided_slice %74 {offsets = [0, 16], sizes = [8, 8], strides = [1, 1]} : vector<8x96xf32> to vector<8x8xf32>
      %cst_55 = arith.constant 0.353553385 : f32
      %110 = vector.broadcast %cst_55 : f32 to vector<8x8xf32>
      %111 = arith.mulf %109, %110 : vector<8x8xf32>
      %112 = arith.truncf %111 : vector<8x8xf32> to vector<8x8xbf16>
      %c2 = arith.constant 2 : index
      %c0_56 = arith.constant 0 : index
      %c0_57 = arith.constant 0 : index
      %113 = vector.load %arg8[%c2, %c0_56, %c0_57] : memref<4x8x8xbf16, #tpu.memory_space<vmem>>, vector<1x8x8xbf16>
      %114 = vector.shape_cast %113 : vector<1x8x8xbf16> to vector<8x8xbf16>
      %115 = vector.shape_cast %112 : vector<8x8xbf16> to vector<1x8x8xbf16>
      tpu.vector_store %arg8[%c2, %c0_56, %c0_57], %115 {strides = array<i32>} : memref<4x8x8xbf16, #tpu.memory_space<vmem>>, vector<1x8x8xbf16>,
      %116 = vector.extract_strided_slice %74 {offsets = [0, 48], sizes = [8, 8], strides = [1, 1]} : vector<8x96xf32> to vector<8x8xf32>
      %117 = arith.truncf %116 : vector<8x8xf32> to vector<8x8xbf16>
      %c2_58 = arith.constant 2 : index
      %c0_59 = arith.constant 0 : index
      %c0_60 = arith.constant 0 : index
      %118 = vector.load %arg9[%c2_58, %c0_59, %c0_60] : memref<4x8x8xbf16, #tpu.memory_space<vmem>>, vector<1x8x8xbf16>
      %119 = vector.shape_cast %118 : vector<1x8x8xbf16> to vector<8x8xbf16>
      %120 = vector.shape_cast %117 : vector<8x8xbf16> to vector<1x8x8xbf16>
      tpu.vector_store %arg9[%c2_58, %c0_59, %c0_60], %120 {strides = array<i32>} : memref<4x8x8xbf16, #tpu.memory_space<vmem>>, vector<1x8x8xbf16>,
      %121 = vector.extract_strided_slice %74 {offsets = [0, 80], sizes = [8, 8], strides = [1, 1]} : vector<8x96xf32> to vector<8x8xf32>
      %122 = arith.truncf %121 : vector<8x8xf32> to vector<8x8xbf16>
      %c2_61 = arith.constant 2 : index
      %c0_62 = arith.constant 0 : index
      %c0_63 = arith.constant 0 : index
      %123 = vector.load %arg10[%c2_61, %c0_62, %c0_63] : memref<4x8x8xbf16, #tpu.memory_space<vmem>>, vector<1x8x8xbf16>
      %124 = vector.shape_cast %123 : vector<1x8x8xbf16> to vector<8x8xbf16>
      %125 = vector.shape_cast %122 : vector<8x8xbf16> to vector<1x8x8xbf16>
      tpu.vector_store %arg10[%c2_61, %c0_62, %c0_63], %125 {strides = array<i32>} : memref<4x8x8xbf16, #tpu.memory_space<vmem>>, vector<1x8x8xbf16>,
      %126 = vector.extract_strided_slice %74 {offsets = [0, 24], sizes = [8, 8], strides = [1, 1]} : vector<8x96xf32> to vector<8x8xf32>
      %cst_64 = arith.constant 0.353553385 : f32
      %127 = vector.broadcast %cst_64 : f32 to vector<8x8xf32>
      %128 = arith.mulf %126, %127 : vector<8x8xf32>
      %129 = arith.truncf %128 : vector<8x8xf32> to vector<8x8xbf16>
      %c3 = arith.constant 3 : index
      %c0_65 = arith.constant 0 : index
      %c0_66 = arith.constant 0 : index
      %130 = vector.load %arg8[%c3, %c0_65, %c0_66] : memref<4x8x8xbf16, #tpu.memory_space<vmem>>, vector<1x8x8xbf16>
      %131 = vector.shape_cast %130 : vector<1x8x8xbf16> to vector<8x8xbf16>
      %132 = vector.shape_cast %129 : vector<8x8xbf16> to vector<1x8x8xbf16>
      tpu.vector_store %arg8[%c3, %c0_65, %c0_66], %132 {strides = array<i32>} : memref<4x8x8xbf16, #tpu.memory_space<vmem>>, vector<1x8x8xbf16>,
      %133 = vector.extract_strided_slice %74 {offsets = [0, 56], sizes = [8, 8], strides = [1, 1]} : vector<8x96xf32> to vector<8x8xf32>
      %134 = arith.truncf %133 : vector<8x8xf32> to vector<8x8xbf16>
      %c3_67 = arith.constant 3 : index
      %c0_68 = arith.constant 0 : index
      %c0_69 = arith.constant 0 : index
      %135 = vector.load %arg9[%c3_67, %c0_68, %c0_69] : memref<4x8x8xbf16, #tpu.memory_space<vmem>>, vector<1x8x8xbf16>
      %136 = vector.shape_cast %135 : vector<1x8x8xbf16> to vector<8x8xbf16>
      %137 = vector.shape_cast %134 : vector<8x8xbf16> to vector<1x8x8xbf16>
      tpu.vector_store %arg9[%c3_67, %c0_68, %c0_69], %137 {strides = array<i32>} : memref<4x8x8xbf16, #tpu.memory_space<vmem>>, vector<1x8x8xbf16>,
      %138 = vector.extract_strided_slice %74 {offsets = [0, 88], sizes = [8, 8], strides = [1, 1]} : vector<8x96xf32> to vector<8x8xf32>
      %139 = arith.truncf %138 : vector<8x8xf32> to vector<8x8xbf16>
      %c3_70 = arith.constant 3 : index
      %c0_71 = arith.constant 0 : index
      %c0_72 = arith.constant 0 : index
      %140 = vector.load %arg10[%c3_70, %c0_71, %c0_72] : memref<4x8x8xbf16, #tpu.memory_space<vmem>>, vector<1x8x8xbf16>
      %141 = vector.shape_cast %140 : vector<1x8x8xbf16> to vector<8x8xbf16>
      %142 = vector.shape_cast %139 : vector<8x8xbf16> to vector<1x8x8xbf16>
      tpu.vector_store %arg10[%c3_70, %c0_71, %c0_72], %142 {strides = array<i32>} : memref<4x8x8xbf16, #tpu.memory_space<vmem>>, vector<1x8x8xbf16>,
    } else {
    }
    %c8_i32 = arith.constant 8 : i32
    %3 = arith.muli %arg1, %c8_i32 : i32
    %4 = tpu.assume_multiple %3, 8 : i32
    %c0 = arith.constant 0 : index
    %c0_1 = arith.constant 0 : index
    %c0_2 = arith.constant 0 : index
    %5 = vector.load %arg8[%c0, %c0_1, %c0_2] : memref<4x8x8xbf16, #tpu.memory_space<vmem>>, vector<4x8x8xbf16>
    %c0_3 = arith.constant 0 : index
    %c0_4 = arith.constant 0 : index
    %c0_5 = arith.constant 0 : index
    %6 = vector.load %arg2[%c0_3, %c0_4, %c0_5] : memref<1x8x32xf32, #tpu.memory_space<vmem>>, vector<1x8x32xf32>
    %7 = vector.shape_cast %6 : vector<1x8x32xf32> to vector<8x32xf32>
    %c0_6 = arith.constant 0 : index
    %c0_7 = arith.constant 0 : index
    %c0_8 = arith.constant 0 : index
    %8 = vector.load %arg9[%c0_6, %c0_7, %c0_8] : memref<4x8x8xbf16, #tpu.memory_space<vmem>>, vector<4x8x8xbf16>
    "tpu.trace_start"() <{level = 10 : i32, message = "hqd,hkd->hqk"}> : () -> ()
    %cst = arith.constant dense<0.000000e+00> : vector<4x8x8xf32>
    %9 = tpu.matmul %5, %8, %cst {dimension_numbers = #tpu.dot_dimension_numbers<[2], [2], [1], [1], [0, 0, 0, 1, 1, 1], [0], [0]>} : vector<4x8x8xbf16>, vector<4x8x8xbf16>, vector<4x8x8xf32> -> vector<4x8x8xf32>
    "tpu.trace_stop"() : () -> ()
    %10 = tpu.iota {dimensions = array<i32: 1>} : vector<4x8x8xi32>
    %11 = vector.broadcast %4 : i32 to vector<4x8x8xi32>
    %12 = arith.addi %11, %10 : vector<4x8x8xi32>
    %13 = tpu.iota {dimensions = array<i32: 2>} : vector<4x8x8xi32>
    %14 = arith.cmpi sge, %12, %13 : vector<4x8x8xi32>
    %cst_9 = arith.constant 0xFF800000 : f32
    %15 = vector.broadcast %cst_9 : f32 to vector<4x8x8xf32>
    %16 = arith.select %14, %9, %15 : vector<4x8x8xi1>, vector<4x8x8xf32>
    %cst_10 = arith.constant dense<0xFF800000> : vector<4x8xf32>
    %17 = vector.multi_reduction <maximumf>, %16, %cst_10 [2] : vector<4x8x8xf32> to vector<4x8xf32>
    %18 = vector.shape_cast %17 : vector<4x8xf32> to vector<4x8x1xf32>
    %19 = vector.broadcast %18 : vector<4x8x1xf32> to vector<4x8x8xf32>
    %20 = arith.subf %16, %19 : vector<4x8x8xf32>
    %21 = math.exp %20 : vector<4x8x8xf32>
    %cst_11 = arith.constant dense<0.000000e+00> : vector<4x8xf32>
    %22 = vector.multi_reduction <add>, %21, %cst_11 [2] : vector<4x8x8xf32> to vector<4x8xf32>
    %23 = vector.shape_cast %22 : vector<4x8xf32> to vector<4x8x1xf32>
    %24 = tpu.reciprocal %23 {approx = true} : vector<4x8x1xf32> -> vector<4x8x1xf32>
    %25 = vector.broadcast %24 : vector<4x8x1xf32> to vector<4x8x8xf32>
    %26 = arith.mulf %21, %25 : vector<4x8x8xf32>
    %27 = arith.truncf %26 : vector<4x8x8xf32> to vector<4x8x8xbf16>
    %c0_12 = arith.constant 0 : index
    %c0_13 = arith.constant 0 : index
    %c0_14 = arith.constant 0 : index
    %28 = vector.load %arg10[%c0_12, %c0_13, %c0_14] : memref<4x8x8xbf16, #tpu.memory_space<vmem>>, vector<4x8x8xbf16>
    "tpu.trace_start"() <{level = 10 : i32, message = "hqk,hkd->hqd"}> : () -> ()
    %cst_15 = arith.constant dense<0.000000e+00> : vector<4x8x8xf32>
    %29 = tpu.matmul %27, %28, %cst_15 {dimension_numbers = #tpu.dot_dimension_numbers<[2], [1], [1], [2], [0, 0, 0, 1, 1, 2], [0], [0]>} : vector<4x8x8xbf16>, vector<4x8x8xbf16>, vector<4x8x8xf32> -> vector<4x8x8xf32>
    "tpu.trace_stop"() : () -> ()
    %30 = vector.extract_strided_slice %29 {offsets = [0, 0, 0], sizes = [1, 8, 8], strides = [1, 1, 1]} : vector<4x8x8xf32> to vector<1x8x8xf32>
    %31 = vector.shape_cast %30 : vector<1x8x8xf32> to vector<8x8xf32>
    %32 = vector.extract_strided_slice %29 {offsets = [1, 0, 0], sizes = [1, 8, 8], strides = [1, 1, 1]} : vector<4x8x8xf32> to vector<1x8x8xf32>
    %33 = vector.shape_cast %32 : vector<1x8x8xf32> to vector<8x8xf32>
    %34 = vector.extract_strided_slice %29 {offsets = [2, 0, 0], sizes = [1, 8, 8], strides = [1, 1, 1]} : vector<4x8x8xf32> to vector<1x8x8xf32>
    %35 = vector.shape_cast %34 : vector<1x8x8xf32> to vector<8x8xf32>
    %36 = vector.extract_strided_slice %29 {offsets = [3, 0, 0], sizes = [1, 8, 8], strides = [1, 1, 1]} : vector<4x8x8xf32> to vector<1x8x8xf32>
    %37 = vector.shape_cast %36 : vector<1x8x8xf32> to vector<8x8xf32>
    %38 = tpu.concatenate %31, %33, %35, %37 in 1 : vector<8x8xf32>, vector<8x8xf32>, vector<8x8xf32>, vector<8x8xf32> -> vector<8x32xf32>
    %39 = arith.addf %7, %38 : vector<8x32xf32>
    %c0_16 = arith.constant 0 : index
    %c0_17 = arith.constant 0 : index
    %c0_18 = arith.constant 0 : index
    %40 = vector.load %arg7[%c0_16, %c0_17, %c0_18] : memref<1x8x32xf32, #tpu.memory_space<vmem>>, vector<1x8x32xf32>
    %41 = vector.shape_cast %40 : vector<1x8x32xf32> to vector<8x32xf32>
    %42 = vector.shape_cast %39 : vector<8x32xf32> to vector<1x8x32xf32>
    tpu.vector_store %arg7[%c0_16, %c0_17, %c0_18], %42 {strides = array<i32>} : memref<1x8x32xf32, #tpu.memory_space<vmem>>, vector<1x8x32xf32>,
    return
  }
  func.func @transform_0(%arg0: i32, %arg1: i32) -> (i32, i32, i32) {
    %c0_i32 = arith.constant 0 : i32
    %c0_i32_0 = arith.constant 0 : i32
    %c0_i32_1 = arith.constant 0 : i32
    return %arg0, %c0_i32, %c0_i32_0 : i32, i32, i32
  }
  func.func @transform_1(%arg0: i32, %arg1: i32) -> (i32, i32) {
    %c0_i32 = arith.constant 0 : i32
    %c0_i32_0 = arith.constant 0 : i32
    %c0_i32_1 = arith.constant 0 : i32
    return %c0_i32, %c0_i32_0 : i32, i32
  }
  func.func @transform_2(%arg0: i32, %arg1: i32) -> (i32, i32) {
    %c0_i32 = arith.constant 0 : i32
    %c0_i32_0 = arith.constant 0 : i32
    %c0_i32_1 = arith.constant 0 : i32
    return %c0_i32, %c0_i32_0 : i32, i32
  }
  func.func @transform_3(%arg0: i32, %arg1: i32) -> (i32, i32) {
    %c0_i32 = arith.constant 0 : i32
    %c0_i32_0 = arith.constant 0 : i32
    %c0_i32_1 = arith.constant 0 : i32
    return %c0_i32, %c0_i32_0 : i32, i32
  }
  func.func @transform_4(%arg0: i32, %arg1: i32) -> (i32, i32) {
    %c0_i32 = arith.constant 0 : i32
    %c0_i32_0 = arith.constant 0 : i32
    %c0_i32_1 = arith.constant 0 : i32
    return %c0_i32, %c0_i32_0 : i32, i32
  }
  func.func @transform_5(%arg0: i32, %arg1: i32) -> (i32, i32, i32) {
    %c0_i32 = arith.constant 0 : i32
    %c0_i32_0 = arith.constant 0 : i32
    return %arg0, %arg1, %c0_i32 : i32, i32, i32
  }
}

</mosaic_0001>

<bundles_post_ra>
// kernel: tpu_custom_call.1
= control target key start
LH: loop header
LB: loop body
LE: loop exit
PB: predicated region body
PF: predicated region fallthrough
CT: control target
= control target key end

     0   :  { %10 = vsyncpa [#allocation6], 0  ;;  %s1735_s0 = inlined_call_operand.hbm [shape: f32[2,8,32], index: 0, kind: input, shape index: {}]   ;;  %s1736_s1 = inlined_call_operand.vmem [shape: f32[1,32], index: 1, kind: input, shape index: {}]   ;;  %s1737_s2 = inlined_call_operand.vmem [shape: f32[1,32], index: 2, kind: input, shape index: {}]   ;;  %s1738_s3 = inlined_call_operand.hbm [shape: bf16[32,96], index: 3, kind: input, shape index: {}]   ;;  %s1739_s4 = inlined_call_operand.vmem [shape: f32[1,96], index: 4, kind: input, shape index: {}]   ;;  %s1740_s5 = inlined_call_operand.hbm [shape: f32[2,8,32], index: 5, kind: output, shape index: {}]  }
   0x1   :  { %12 = vsyncpa [#allocation6 + $0x1], 0 }
   0x2   :  { %13 = vsyncpa [#allocation9], 0 }
   0x3   :  { %14 = vsyncpa [#allocation7], 0 }
   0x4   :  { %16 = vsyncpa [#allocation7 + $0x1], 0  ;;  %s1420_s18 = smov 0   ;;  %s1422_s19 = smov 0  }
   0x5   :  { %s1424_s20 = smov 0   ;;  %s1426_s21 = smov 0  }
   0x6   :  { %s1428_s22 = smov 0   ;;  %s1430_s23 = smov 0  }
   0x7 LB: > { %s1004_s24 = sadd.s32 4294967295, %s1367_s23   ;;  %s1005_s25 = sadd.s32 4294967294, %s1367_s23   ;;  %s1367_s23 = sphi %s1430_s23, %s22_s23   ;;  %s1363_s22 = sphi %s1428_s22, %s1764_s22   ;;  %s1359_s21 = sphi %s1426_s21, %s1763_s21   ;;  %s1355_s20 = sphi %s1424_s20, %s1762_s20   ;;  %s1351_s19 = sphi %s1422_s19, %s1761_s19   ;;  %s1347_s18 = sphi %s1420_s18, %s1760_s18  }
   0x8   : > { %p54_p0 = scmp.ne.s32.totalorder %s1351_s19, %s1347_s18  ;;  %p1454_p1 = scmp.eq.s32.totalorder %s1004_s24, 0 }
   0x9   : > { %p1458_p2 = scmp.eq.s32.totalorder %s1004_s24, 1  ;;  %p170_p3 = scmp.eq.s32.totalorder %s1005_s25, 1 }
   0xa   : > { %s1745_s26 = scalar_select %p1454_p1, 1, 0 }
   0xb   : > { %s1746_s27 = scalar_select %p1458_p2, 1, 0 }
   0xc   : > { %p1464_p4 = por %p1454_p1, %p54_p0  ;;  %p1006_p5 = scmp.ge.s32.totalorder %s1367_s23, 1 }
   0xd   : > { %p1469_p6 = por %p170_p3, %p54_p0  ;;  %p177_p7 = scmp.lt.s32.totalorder %s1367_s23, 3 }
   0xe   : > { %s1747_s28 = scalar_select %p1464_p4, 1, 0 }
   0xf   : > { %s1748_s29 = scalar_select %p1469_p6, 1, 0 }
  0x10   : > { %p1474_p8 = pnand %p1006_p5, %p177_p7  ;;  %s1369_s6 = smov [#allocation8]  }
  0x11   : > { %s195_s7 = sshll.u32 %s1369_s6, 4  ;;  %s34_s9 = sadd.s32 1, %s1363_s22  ;;  %s196_s7 = int_to_ptr.vmem [resolvable:$true] %s195_s7 }
  0x12   : > { %s1749_s30 = scalar_select %p1474_p8, 1, 0 }
  0x13   : > { %p1120_p9 = pneg %p1474_p8  ;;  %s1223_s12 = scalar_lea.hbm %s1738_s3, 256 }
  0x14   : > { %p1224_p12 = scmp.ne.s32.totalorder %s1738_s3, %s1223_s12  ;;  %p1230_p5 = scmp.lt.u32.totalorder %s1223_s12, %s1738_s3 }
  0x15   : > { %p1483_p11 = pnand %p1120_p9, %p1454_p1 }
  0x17   : > { %p1225_p13 = pneg %p1483_p11 }
  0x19   : > { %p1226_p0 = pnand %p1225_p13, %p1224_p12 }
  0x1b   : > { %p1227_p3 = pneg %p1226_p0 }
  0x1d   : > { %p1232_p7 = pnand %p1230_p5, %p1227_p3 }
  0x1f   : > { %1235 = shalt.err (!%p1232_p7)
}
  0x20   : > { %s1236_s17 = scalar_lea.vmem %s196_s7, 256  ;;  %p1244_p1 = scmp.lt.s32.totalorder %s196_s7, %s196_s7 }
  0x21   : > { %p1237_p9 = scmp.ne.s32.totalorder %s196_s7, %s1236_s17  ;;  %p1245_p4 = scmp.lt.s32.totalorder %s1236_s17, %s1236_s17 }
  0x23   : > { %p1239_p10 = pnand %p1237_p9, %p1225_p13  ;;  %p1246_p8 = por %p1245_p4, %p1244_p1 }
  0x25   : > { %p1240_p6 = pneg %p1239_p10 }
  0x27   : > { %p1247_p2 = pnand %p1246_p8, %p1240_p6 }
  0x29   : > { %1250 = shalt.err (!%p1247_p2)
}
  0x2a   : > { %s1370_s24 = smov 64   ;;  %s1371_s25 = smov 4  }
  0x2b   : > { %1123 = dma.hbm_to_vmem [thread:$0]  (!%p1483_p11), %s1738_s3, 256, %s196_s7, [#allocation9], %s1370_s24, %s1370_s24, %s1371_s25  }
  0x2c   : > { %p36_p1 = scmp.ge.s32.totalorder %s34_s9, 2  ;;  %s41_s11 = sadd.s32 1, %s1355_s20 }
  0x2d   : > { %p48_p2 = scmp.ne.s32.totalorder %s1355_s20, %s1351_s19  ;;  %p49_p4 = scmp.eq.s32.totalorder %s1367_s23, 0 }
  0x2e   : > { %s1766_s9 = smov (%p36_p1, %s34_s9), 0  ;;  %p1752_p8 = scmp.ne.s32.totalorder %s1746_s27, 0 }
  0x2f   : > { %p1510_p6 = por %p49_p4, %p48_p2  ;;  %s38_s8 = ssub.s32 %s1363_s22, %s1766_s9 }
  0x30   : > { %p1516_p10 = por %p1752_p8, %p48_p2  ;;  %p1133_p12 = scmp.lt.s32.totalorder %s1367_s23, 2 }
  0x31   : > { %p39_p11 = scmp.eq.s32.totalorder %s38_s8, 0  ;;  %s212_s7 = sand.u32 1, %s1355_s20  }
  0x32   : > { %s1009_s14 = sshll.u32 %s212_s7, 3  ;;  %s1010_s16 = sshll.u32 %s1363_s22, 7 }
  0x33   : > { %s1525_s15 = scalar_select %p39_p11, %s1355_s20, %s41_s11  }
  0x34   : > { %s1531_s25 = scalar_lea.hbm %s1735_s0, %s1010_s16  ;;  %s216_s27 = scalar_lea.vmem [#allocation5], %s1009_s14 }
  0x35   : > { %s223_s6 = sshll.u32 %s216_s27, 4  ;;  %p1537_p13 = pnand %p1133_p12, %p1510_p6  ;;  %s1533_s6 = int_to_ptr.vmem [resolvable:$true] %s223_s6 }
  0x36   : > { %s213_s11 = scalar_lea.sflag [#allocation6], %s212_s7  ;;  %s1251_s8 = scalar_lea.hbm %s1531_s25, 128 }
  0x37   : > { %p1252_p0 = scmp.ne.s32.totalorder %s1531_s25, %s1251_s8  ;;  %p1253_p3 = pneg %p1537_p13 }
  0x38   : > { %s1256_s17 = scalar_lea.hbm %s1735_s0, 256  ;;  %p1257_p9 = scmp.lt.u32.totalorder %s1531_s25, %s1735_s0 }
  0x39   : > { %p1254_p5 = pnand %p1253_p3, %p1252_p0  ;;  %p1258_p1 = scmp.lt.u32.totalorder %s1256_s17, %s1251_s8 }
  0x3a   : > { %p1260_p4 = scmp.lt.u32.totalorder %s1251_s8, %s1531_s25 }
  0x3b   : > { %p1255_p7 = pneg %p1254_p5  ;;  %p1259_p2 = por %p1258_p1, %p1257_p9 }
  0x3d   : > { %p1261_p6 = por %p1260_p4, %p1259_p2 }
  0x3f   : > { %p1262_p8 = pnand %p1261_p6, %p1255_p7 }
  0x41   : > { %1265 = shalt.err (!%p1262_p8)
}
  0x42   : > { %s1266_s7 = scalar_lea.vmem %s1533_s6, 128  ;;  %s1372_s27 = smov [#allocation5]  }
  0x43   : > { %p1267_p12 = scmp.ne.s32.totalorder %s1533_s6, %s1266_s7  ;;  %s1271_s14 = sshll.u32 %s1372_s27, 4  ;;  %s1272_s14 = int_to_ptr.vmem [resolvable:$false] %s1271_s14 }
  0x44   : > { %s1273_s16 = scalar_lea.vmem %s1272_s14, 256  ;;  %p1274_p5 = scmp.lt.s32.totalorder %s1533_s6, %s1272_s14 }
  0x45   : > { %p1269_p11 = pnand %p1267_p12, %p1253_p3  ;;  %p1275_p9 = scmp.lt.s32.totalorder %s1273_s16, %s1266_s7 }
  0x47   : > { %p1270_p0 = pneg %p1269_p11  ;;  %p1276_p1 = por %p1275_p9, %p1274_p5 }
  0x49   : > { %p1277_p2 = pnand %p1276_p1, %p1270_p0 }
  0x4b   : > { %1280 = shalt.err (!%p1277_p2)
}
  0x4c   : > { %1127 = dma.hbm_to_vmem [thread:$0]  (!%p1537_p13), %s1531_s25, 128, %s1533_s6, %s213_s11  }
  0x4d   : > { %p1755_p7 = scmp.ne.s32.totalorder %s1749_s30, 0 }
  0x4e   : > { %s1569_s8 = sand.u32 (!%p1755_p7), 1, %s1351_s19   ;;  %p1756_p3 = scmp.ne.s32.totalorder (!%p1755_p7), %s1747_s28, 0 }
  0x4f   : > { %232 = sbr.rel (%p1755_p7) target bundleno = 1647 (0x66f), region = 40  ;;  %s1012_s17 = sshll.u32 (!%p1755_p7), %s1569_s8, 3 }
  0x50   : > { %s235_s12 = scalar_lea.sflag (!%p1755_p7), [#allocation6], %s1569_s8  ;;  %s238_s24 = scalar_lea.vmem (!%p1755_p7), [#allocation5], %s1012_s17 }
  0x56   : > { %1334 = dma.done.wait (%p1756_p3), %s235_s12, 128  }
  0x57   : > { %1336 = vsyncadd (%p1756_p3), %s235_s12, 4294967168  ;;  %p1757_p13 = scmp.ne.s32.totalorder %s1745_s26, 0 }
  0x59   : > { %1338 = dma.done.wait (%p1757_p13), [#allocation9], 256  }
  0x5a   : > { %1340 = vsyncadd (%p1757_p13), [#allocation9], 4294967040  ;;  %vm277_vm0 = vcmask 261120   ;;  %v1583_v0 = vld [vmem:[%s238_s24] sm:$0xff]  ;;  %v1203_v7 = vld [vmem:[#allocation8] sm:$0xff]   ;;  %v1373_v8 = vmov 0.0   ;;  %v632_v48 = vlaneseq }
  0x5b   : > { %v278_v1 = vsel %vm277_vm0, %v1583_v0, 0.0  ;;  %1056 = vmatprep.subr.bf16.mxu0 %v1373_v8  ;;  %vm1374_vm1 = vmmov 0   ;;  %v1204_v9 = vld [vmem:[#allocation8 + $0x8] sm:$0xff]   ;;  %1064 = vmatprep.subr.bf16.mxu1 %v1373_v8  ;;  %v1015_v14 = vld [vmem:[%s1736_s1] ss:$0 sm:$0xff]  ;;  %vm375_vm2 = vcmask 60416  }
  0x5c   : > { %279 = vadd.xlane.f32.xlu0 %v278_v1  ;;  %1060 = vmatprep.mubr.msk.bf16.mxu0 %vm1374_vm1, %v1373_v8  ;;  %v1016_v16 = vld [vmem:[%s1737_s2] ss:$0 sm:$0xff]  ;;  %s1375_s11 = smov 80   ;;  %s1376_s7 = smov 96   ;;  %vm447_vm3 = vcmask 64512   ;;  %v633_v49 = vshrl.u32 %v632_v48, 7 }
  0x5d   : > { %1057 = vmatpush3.bf16.msra.mxu0 %v1203_v7  ;;  %1066 = vmatprep.mubr.msk.bf16.mxu1 %vm1374_vm1, %v1373_v8  ;;  %v1017_v20 = vld [vmem:[%s1739_s4] ss:$0 sm:$0xff]  ;;  %s1377_s27 = smov 88   ;;  %s1378_s14 = smov 72   ;;  %v637_v50 = vand.u32 127, %v632_v48  ;;  %vm698_vm5 = vcmask 1043456  }
  0x5e   : > { %1058 = vmatprep.subr.bf16.mxu0 %v1373_v8  ;;  %s1379_s16 = smov 120   ;;  %s1380_s12 = smov 112   ;;  %vm893_vm6 = vcmask 130048   ;;  %vm895_vm7 = vcmask 195584  }
  0x5f   : > { %s1381_s24 = smov 104   ;;  %vm638_vm4 = vcmp.ge.s32.totalorder %v633_v49, %v637_v50  ;;  %s1382_s26 = smov 64  }
  0x60   : > { %s1383_s28 = smov 48   ;;  %s1384_s30 = smov 40  }
  0x61   : > { %1059 = vmatpush3.bf16.msra.mxu0 %v1204_v9  ;;  %s1385_s25 = smov 56   ;;  %s1386_s6 = smov 16  }
  0x62   : > { %1070 = vmatprep.subr.bf16.mxu0 %v1373_v8  ;;  %s1387_s10 = smov 8  }
  0xe9   : > { %v280_v2 = vpop.xlane.xlu0 %279 }
  0xea   : > { %v282_v3 = vmul.f32 0.03125, %v280_v2 }
  0xec   : > { %v283_v4 = vsub.f32 %v1583_v0, %v282_v3 }
  0xee   : > { %v284_v5 = vmul.f32 %v283_v4, %v283_v4 }
  0xf0   : > { %v285_v6 = vsel %vm277_vm0, %v284_v5, 0.0 }
  0xf1   : > { %286 = vadd.xlane.f32.xlu0 %v285_v6 }
 0x17e   : > { %v287_v10 = vpop.xlane.xlu0 %286 }
 0x17f   : > { %v288_v11 = vmul.f32 0.03125, %v287_v10 }
 0x181   : > { %v289_v12 = vadd.f32 1e-05, %v288_v11 }
 0x183   : > { %1205 = vrsqrt.f32 %v289_v12 }
 0x18d   : > { %v1206_v13 = vpop.eup %1205 }
 0x18e   : > { %v291_v15 = vmul.f32 %v1206_v13, %v283_v4 }
 0x190   : > { %v298_v17 = vmul.f32 %v1015_v14, %v291_v15 }
 0x192   : > { %v305_v18 = vadd.f32 %v1016_v16, %v298_v17 }
 0x194   : > { %v306_v19 = vpack.c.bf16 %v305_v18, %v305_v18 }
 0x196   : > { %1061 = vmatmul.mubr.msk.bf16.vlgmr.msra.gmra.mrb[0].mxu0 %vm277_vm0, %v306_v19 }
 0x197   : > { %1072 = vmatprep.mubr.msk.bf16.mxu0 %vm1374_vm1, %v1373_v8 }
 0x269   : > { %v367_v21 = vpop.f32.mrb[0].mxu0 }
 0x26a   : > { %v368_v22 = vadd.f32 %v1017_v20, %v367_v21  ;;  %v1062_v23 = vpop.f32.mrb[1].mxu0 }
 0x26b   : > { %v370_v24 = vpop.f32.mrb[2].mxu0 }
 0x26c   : > { %v373_v25 = vmul.f32 0.35355338, %v368_v22  ;;  %v1609_v26 = vpack.c.bf16 %v368_v22, %v368_v22  ;;  %v1063_v27 = vpop.f32.mrb[3].mxu0 }
 0x26e   : > { %v374_v28 = vpack.c.bf16 %v373_v25, %v373_v25  ;;  %412 = vrot.lane.b32.xlu0 %v1609_v26, %s1375_s11  ;;  %381 = vrot.lane.b32.xlu1 %v1609_v26, %s1376_s7  ;;  %s1388_s11 = smov 24   ;;  %s1032_s7 = sshll.u32 %s1359_s21, 7 }
 0x26f   : > { %s901_s21 = scalar_lea.sflag [#allocation7], %s1569_s8 }
 0x270   : > { %376 = vst.msk [vmem:[#allocation2] sm:$0xf] %vm375_vm2, %v374_v28 }
 0x272   : > { %397 = vrot.lane.b32.xlu1 %v1609_v26, %s1377_s27  ;;  %s268_s27 = scalar_lea.vmem [#allocation10], %s1012_s17 }
 0x276   : > { %427 = vrot.lane.b32.xlu1 %v1609_v26, %s1378_s14  ;;  %s915_s14 = sshll.u32 %s268_s27, 4  ;;  %s1687_s14 = int_to_ptr.vmem [resolvable:$true] %s915_s14 }
 0x277   : > { %v438_v40 = vld [vmem:[#allocation2] sm:$0xf]  ;;  %s1281_s17 = scalar_lea.vmem %s1687_s14, 128 }
 0x278   : > { %p1282_p4 = scmp.ne.s32.totalorder %s1687_s14, %s1281_s17 }
 0x27a   : > { %392 = vrot.lane.b32.xlu1 %v374_v28, %s1379_s16  ;;  %p1283_p6 = pnand %p1282_p4, %p1516_p10 }
 0x27c   : > { %p1284_p8 = pneg %p1283_p6 }
 0x27e   : > { %407 = vrot.lane.b32.xlu1 %v374_v28, %s1380_s12 }
 0x282   : > { %422 = vrot.lane.b32.xlu1 %v374_v28, %s1381_s24  ;;  %s1685_s24 = scalar_lea.hbm %s1740_s5, %s1032_s7 }
 0x2e0   : > { %v413_v29 = vpop.permute.xlu0 %412  ;;  %v382_v30 = vpop.permute.xlu1 %381 }
 0x2e1   : > { %416 = vst.msk [vmem:[#allocation3 + $0x8] sm:$0xf] %vm375_vm2, %v413_v29  ;;  %384 = vst.msk [vmem:[#allocation3] sm:$0xf] %vm375_vm2, %v382_v30 }
 0x2e4   : > { %v398_v31 = vpop.permute.xlu1 %397 }
 0x2e5   : > { %401 = vst.msk [vmem:[#allocation3 + $0x4] sm:$0xf] %vm375_vm2, %v398_v31 }
 0x2e8   : > { %v428_v32 = vpop.permute.xlu1 %427  ;;  %v443_v33 = vld [vmem:[#allocation3] sm:$0xf]  ;;  %v445_v38 = vld [vmem:[#allocation3 + $0x8] sm:$0xf] }
 0x2e9   : > { %431 = vst.msk [vmem:[#allocation3 + $0xc] sm:$0xf] %vm375_vm2, %v428_v32  ;;  %v452_v34 = vsel %vm447_vm3, %v443_v33, 0  ;;  %v544_v41 = vsel %vm447_vm3, %v445_v38, 0 }
 0x2ea   : > { %1065 = vmatpush3.bf16.xpose.msra.mxu1 %v452_v34 }
 0x2eb   : > { %1076 = vmatprep.subr.bf16.mxu1 %v1373_v8 }
 0x2ec   : > { %v393_v35 = vpop.permute.xlu1 %392  ;;  %v444_v36 = vld [vmem:[#allocation3 + $0x4] sm:$0xf] }
 0x2ed   : > { %396 = vst.msk [vmem:[#allocation2 + $0x4] sm:$0xf] %vm375_vm2, %v393_v35  ;;  %v498_v37 = vsel %vm447_vm3, %v444_v36, 0 }
 0x2ee   : > { %1071 = vmatpush3.bf16.xpose.msra.mxu0 %v498_v37 }
 0x2ef   : > { %1082 = vmatprep.subr.bf16.mxu0 %v1373_v8 }
 0x2f0   : > { %v408_v39 = vpop.permute.xlu1 %407  ;;  %v446_v42 = vld [vmem:[#allocation3 + $0xc] sm:$0xf] }
 0x2f1   : > { %411 = vst.msk [vmem:[#allocation2 + $0x8] sm:$0xf] %vm375_vm2, %v408_v39  ;;  %1067 = vmatmul.mubr.msk.bf16.vlgmr.msra.gmra.mrb[0].mxu1 %vm447_vm3, %v438_v40  ;;  %v590_v45 = vsel %vm447_vm3, %v446_v42, 0 }
 0x2f2   : > { %1077 = vmatpush3.bf16.xpose.msra.mxu1 %v544_v41  ;;  %1078 = vmatprep.mubr.msk.bf16.mxu1 %vm1374_vm1, %v1373_v8 }
 0x2f3   : > { %1088 = vmatprep.subr.bf16.mxu1 %v1373_v8 }
 0x2f4   : > { %v423_v43 = vpop.permute.xlu1 %422  ;;  %v439_v44 = vld [vmem:[#allocation2 + $0x4] sm:$0xf] }
 0x2f5   : > { %426 = vst.msk [vmem:[#allocation2 + $0xc] sm:$0xf] %vm375_vm2, %v423_v43  ;;  %1073 = vmatmul.mubr.msk.bf16.vlgmr.msra.gmra.mrb[4].mxu0 %vm447_vm3, %v439_v44 }
 0x2f6   : > { %1083 = vmatpush3.bf16.xpose.msra.mxu0 %v590_v45  ;;  %1084 = vmatprep.mubr.msk.bf16.mxu0 %vm1374_vm1, %v1373_v8 }
 0x2f7   : > { %1094 = vmatprep.subr.bf16.mxu0 %v1373_v8 }
 0x2f8   : > { %v440_v46 = vld [vmem:[#allocation2 + $0x8] sm:$0xf] }
 0x2f9   : > { %1079 = vmatmul.mubr.msk.bf16.vlgmr.msra.gmra.mrb[4].mxu1 %vm447_vm3, %v440_v46 }
 0x2fa   : > { %1090 = vmatprep.mubr.msk.bf16.mxu1 %vm1374_vm1, %v1373_v8 }
 0x2fc   : > { %v441_v47 = vld [vmem:[#allocation2 + $0xc] sm:$0xf] }
 0x2fd   : > { %1085 = vmatmul.mubr.msk.bf16.vlgmr.msra.gmra.mrb[8].mxu0 %vm447_vm3, %v441_v47 }
 0x2fe   : > { %1096 = vmatprep.mubr.msk.bf16.mxu0 %vm1374_vm1, %v1373_v8 }
 0x3c4   : > { %v488_v51 = vpop.f32.mrb[0].mxu1 }
 0x3c5   : > { %v639_v52 = vsel %vm638_vm4, %v488_v51, -inf  ;;  %v1068_v53 = vpop.f32.mrb[1].mxu1 }
 0x3c6   : > { %v491_v54 = vpop.f32.mrb[2].mxu1  ;;  %v643_v55 = vsel %vm447_vm3, %v639_v52, -inf }
 0x3c7   : > { %644 = vmax.xlane.f32.xlu1 %v643_v55  ;;  %v1069_v56 = vpop.f32.mrb[3].mxu1 }
 0x3c8   : > { %v534_v57 = vpop.f32.mrb[4].mxu0 }
 0x3c9   : > { %v640_v58 = vsel %vm638_vm4, %v534_v57, -inf  ;;  %v1074_v59 = vpop.f32.mrb[5].mxu0 }
 0x3ca   : > { %v537_v60 = vpop.f32.mrb[6].mxu0  ;;  %v646_v61 = vsel %vm447_vm3, %v640_v58, -inf }
 0x3cb   : > { %647 = vmax.xlane.f32.xlu0 %v646_v61  ;;  %v1075_v62 = vpop.f32.mrb[7].mxu0 }
 0x3cc   : > { %v580_v63 = vpop.f32.mrb[4].mxu1 }
 0x3cd   : > { %v641_v1 = vsel %vm638_vm4, %v580_v63, -inf  ;;  %v1080_v2 = vpop.f32.mrb[5].mxu1 }
 0x3ce   : > { %v583_v3 = vpop.f32.mrb[6].mxu1  ;;  %v649_v4 = vsel %vm447_vm3, %v641_v1, -inf }
 0x3cf   : > { %650 = vmax.xlane.f32.xlu1 %v649_v4  ;;  %v1081_v5 = vpop.f32.mrb[7].mxu1 }
 0x3d0   : > { %v626_v6 = vpop.f32.mrb[8].mxu0 }
 0x3d1   : > { %v642_v7 = vsel %vm638_vm4, %v626_v6, -inf  ;;  %v1086_v9 = vpop.f32.mrb[9].mxu0 }
 0x3d2   : > { %v629_v10 = vpop.f32.mrb[10].mxu0  ;;  %v652_v11 = vsel %vm447_vm3, %v642_v7, -inf }
 0x3d3   : > { %653 = vmax.xlane.f32.xlu0 %v652_v11  ;;  %v1087_v12 = vpop.f32.mrb[11].mxu0 }
 0x3e0   : > { %385 = vrot.lane.b32.xlu1 %v1609_v26, %s1382_s26  ;;  %s1389_s26 = smov [#allocation10]  }
 0x454   : > { %v645_v13 = vpop.xlane.xlu1 %644 }
 0x455   : > { %v655_v14 = vsub.f32 %v639_v52, %v645_v13 }
 0x457   : > { %v659_v15 = vmul.f32 1.442695, %v655_v14 }
 0x458   : > { %v648_v16 = vpop.xlane.xlu0 %647 }
 0x459   : > { %1207 = vpow2.f32 %v659_v15  ;;  %v656_v17 = vsub.f32 %v640_v58, %v648_v16 }
 0x45b   : > { %v661_v18 = vmul.f32 1.442695, %v656_v17 }
 0x45c   : > { %v651_v19 = vpop.xlane.xlu1 %650 }
 0x45d   : > { %1209 = vpow2.f32 %v661_v18  ;;  %v657_v20 = vsub.f32 %v641_v1, %v651_v19 }
 0x45f   : > { %v663_v21 = vmul.f32 1.442695, %v657_v20 }
 0x460   : > { %v386_v22 = vpop.permute.xlu1 %385  ;;  %v654_v23 = vpop.xlane.xlu0 %653 }
 0x461   : > { %1211 = vpow2.f32 %v663_v21  ;;  %388 = vst.msk [vmem:[#allocation4] sm:$0xf] %vm375_vm2, %v386_v22  ;;  %v658_v24 = vsub.f32 %v642_v7, %v654_v23 }
 0x463   : > { %v1208_v25 = vpop.eup %1207  ;;  %v665_v27 = vmul.f32 1.442695, %v658_v24 }
 0x464   : > { %v667_v28 = vsel %vm447_vm3, %v1208_v25, 0.0 }
 0x465   : > { %1213 = vpow2.f32 %v665_v27  ;;  %668 = vadd.xlane.f32.xlu1 %v667_v28 }
 0x467   : > { %v1210_v29 = vpop.eup %1209 }
 0x468   : > { %v670_v30 = vsel %vm447_vm3, %v1210_v29, 0.0  ;;  %v691_v31 = vld [vmem:[#allocation4] sm:$0xf] }
 0x469   : > { %671 = vadd.xlane.f32.xlu0 %v670_v30  ;;  %v700_v32 = vsel %vm698_vm5, %v691_v31, 0 }
 0x46a   : > { %1089 = vmatpush3.bf16.msra.mxu1 %v700_v32 }
 0x46b   : > { %v1212_v33 = vpop.eup %1211  ;;  %1100 = vmatprep.subr.bf16.mxu1 %v1373_v8 }
 0x46c   : > { %v673_v34 = vsel %vm447_vm3, %v1212_v33, 0.0 }
 0x46d   : > { %674 = vadd.xlane.f32.xlu1 %v673_v34 }
 0x46f   : > { %v1214_v35 = vpop.eup %1213 }
 0x470   : > { %v676_v36 = vsel %vm447_vm3, %v1214_v35, 0.0 }
 0x471   : > { %677 = vadd.xlane.f32.xlu0 %v676_v36 }
 0x47e   : > { %417 = vrot.lane.b32.xlu1 %v1609_v26, %s1383_s28  ;;  %s1285_s28 = sshll.u32 %s1389_s26, 4  ;;  %s1286_s28 = int_to_ptr.vmem [resolvable:$false] %s1285_s28 }
 0x47f   : > { %p1288_p12 = scmp.lt.s32.totalorder %s1687_s14, %s1286_s28 }
 0x482   : > { %432 = vrot.lane.b32.xlu1 %v1609_v26, %s1384_s30  ;;  %s1287_s30 = scalar_lea.vmem %s1286_s28, 256 }
 0x483   : > { %p1289_p11 = scmp.lt.s32.totalorder %s1287_s30, %s1281_s17 }
 0x485   : > { %p1290_p0 = por %p1289_p11, %p1288_p12 }
 0x487   : > { %402 = vrot.lane.b32.xlu0 %v1609_v26, %s1385_s25  ;;  %p1291_p5 = pnand %p1290_p0, %p1284_p8 }
 0x4f2   : > { %v669_v37 = vpop.xlane.xlu1 %668 }
 0x4f3   : > { %1215 = vrcp.f32 %v669_v37 }
 0x4f6   : > { %v672_v38 = vpop.xlane.xlu0 %671 }
 0x4fa   : > { %v675_v39 = vpop.xlane.xlu1 %674 }
 0x4fb   : > { %1217 = vrcp.f32 %v675_v39 }
 0x4fc   : > { %1219 = vrcp.f32 %v672_v38 }
 0x4fd   : > { %v1216_v40 = vpop.eup %1215 }
 0x4fe   : > { %v683_v41 = vmul.f32 %v1216_v40, %v1208_v25  ;;  %v418_v42 = vpop.permute.xlu1 %417  ;;  %v678_v43 = vpop.xlane.xlu0 %677 }
 0x4ff   : > { %421 = vst.msk [vmem:[#allocation4 + $0x8] sm:$0xf] %vm375_vm2, %v418_v42  ;;  %1221 = vrcp.f32 %v678_v43 }
 0x500   : > { %v687_v44 = vpack.c.bf16 %v683_v41, %v683_v41 }
 0x502   : > { %1091 = vmatmul.mubr.msk.bf16.vlgmr.msra.gmra.mrb[8].mxu1 %vm447_vm3, %v687_v44  ;;  %v433_v45 = vpop.permute.xlu1 %432  ;;  %v403_v46 = vpop.permute.xlu0 %402 }
 0x503   : > { %436 = vst.msk [vmem:[#allocation4 + $0xc] sm:$0xf] %vm375_vm2, %v433_v45  ;;  %406 = vst.msk [vmem:[#allocation4 + $0x4] sm:$0xf] %vm375_vm2, %v403_v46  ;;  %1102 = vmatprep.mubr.msk.bf16.mxu1 %vm1374_vm1, %v1373_v8 }
 0x505   : > { %v1218_v26 = vpop.eup %1217 }
 0x506   : > { %v1220_v47 = vpop.eup %1219  ;;  %v685_v48 = vmul.f32 %v1218_v26, %v1212_v33  ;;  %v693_v49 = vld [vmem:[#allocation4 + $0x8] sm:$0xf] }
 0x507   : > { %v792_v50 = vsel %vm698_vm5, %v693_v49, 0  ;;  %v684_v52 = vmul.f32 %v1220_v47, %v1210_v29 }
 0x508   : > { %1101 = vmatpush3.bf16.msra.mxu1 %v792_v50  ;;  %v689_v51 = vpack.c.bf16 %v685_v48, %v685_v48 }
 0x509   : > { %v688_v56 = vpack.c.bf16 %v684_v52, %v684_v52  ;;  %v1222_v57 = vpop.eup %1221 }
 0x50a   : > { %v692_v53 = vld [vmem:[#allocation4 + $0x4] sm:$0xf]  ;;  %v694_v55 = vld [vmem:[#allocation4 + $0xc] sm:$0xf]  ;;  %v686_v59 = vmul.f32 %v1222_v57, %v1214_v35 }
 0x50b   : > { %1103 = vmatmul.mubr.msk.bf16.vlgmr.msra.gmra.mrb[12].mxu1 %vm447_vm3, %v689_v51  ;;  %v746_v54 = vsel %vm698_vm5, %v692_v53, 0  ;;  %v838_v58 = vsel %vm698_vm5, %v694_v55, 0 }
 0x50c   : > { %1095 = vmatpush3.bf16.msra.mxu0 %v746_v54  ;;  %v690_v60 = vpack.c.bf16 %v686_v59, %v686_v59 }
 0x50d   : > { %1106 = vmatprep.subr.bf16.mxu0 %v1373_v8 }
 0x50f   : > { %1097 = vmatmul.mubr.msk.bf16.vlgmr.msra.gmra.mrb[12].mxu0 %vm447_vm3, %v688_v56 }
 0x510   : > { %1107 = vmatpush3.bf16.msra.mxu0 %v838_v58  ;;  %1108 = vmatprep.mubr.msk.bf16.mxu0 %vm1374_vm1, %v1373_v8 }
 0x517   : > { %1109 = vmatmul.mubr.msk.bf16.vlgmr.msra.gmra.mrb[16].mxu0 %vm447_vm3, %v690_v60 }
 0x5d5   : > { %v736_v61 = vpop.f32.mrb[8].mxu1 }
 0x5d6   : > { %v1092_v62 = vpop.f32.mrb[9].mxu1 }
 0x5d7   : > { %v739_v63 = vpop.f32.mrb[10].mxu1 }
 0x5d8   : > { %v1093_v1 = vpop.f32.mrb[11].mxu1 }
 0x5de   : > { %v828_v2 = vpop.f32.mrb[12].mxu1 }
 0x5df   : > { %885 = vrot.lane.b32.xlu1 %v828_v2, %s1386_s6  ;;  %v1104_v3 = vpop.f32.mrb[13].mxu1 }
 0x5e0   : > { %v831_v4 = vpop.f32.mrb[14].mxu1 }
 0x5e1   : > { %v1105_v5 = vpop.f32.mrb[15].mxu1 }
 0x5e2   : > { %v782_v6 = vpop.f32.mrb[12].mxu0 }
 0x5e3   : > { %881 = vrot.lane.b32.xlu0 %v782_v6, %s1387_s10  ;;  %v1098_v8 = vpop.f32.mrb[13].mxu0 }
 0x5e4   : > { %v785_v7 = vpop.f32.mrb[14].mxu0 }
 0x5e5   : > { %v1099_v9 = vpop.f32.mrb[15].mxu0 }
 0x5ea   : > { %v874_v10 = vpop.f32.mrb[16].mxu0 }
 0x5eb   : > { %889 = vrot.lane.b32.xlu0 %v874_v10, %s1388_s11  ;;  %v1110_v11 = vpop.f32.mrb[17].mxu0 }
 0x5ec   : > { %v877_v12 = vpop.f32.mrb[18].mxu0 }
 0x5ed   : > { %v1111_v13 = vpop.f32.mrb[19].mxu0 }
 0x651   : > { %v886_v16 = vpop.permute.xlu1 %885 }
 0x655   : > { %v882_v14 = vpop.permute.xlu0 %881 }
 0x656   : > { %v892_v15 = vsel %vm447_vm3, %v736_v61, %v882_v14 }
 0x657   : > { %v894_v17 = vsel %vm893_vm6, %v892_v15, %v886_v16 }
 0x65d   : > { %v890_v18 = vpop.permute.xlu0 %889 }
 0x65e   : > { %v896_v19 = vsel %vm895_vm7, %v894_v17, %v890_v18 }
 0x65f   : > { %v897_v20 = vadd.f32 %v896_v19, %v1583_v0 }
 0x661   : > { %899 = vst.msk [vmem:[%s268_s27] sm:$0xff] %vm277_vm0, %v897_v20 }
 0x662   : > { %1294 = shalt.err (!%p1291_p5)
}
 0x663   : > { %s1295_s8 = scalar_lea.hbm %s1685_s24, 128  ;;  %s1299_s10 = scalar_lea.hbm %s1740_s5, 256 }
 0x664   : > { %p1296_p9 = scmp.ne.s32.totalorder %s1685_s24, %s1295_s8  ;;  %p1300_p7 = scmp.lt.u32.totalorder %s1685_s24, %s1740_s5 }
 0x665   : > { %p1301_p3 = scmp.lt.u32.totalorder %s1299_s10, %s1295_s8  ;;  %p1303_p4 = scmp.lt.u32.totalorder %s1295_s8, %s1685_s24 }
 0x666   : > { %p1297_p1 = pnand %p1296_p9, %p1516_p10 }
 0x667   : > { %p1302_p13 = por %p1301_p3, %p1300_p7 }
 0x668   : > { %p1298_p2 = pneg %p1297_p1 }
 0x669   : > { %p1304_p6 = por %p1303_p4, %p1302_p13 }
 0x66b   : > { %p1305_p8 = pnand %p1304_p6, %p1298_p2 }
 0x66d   : > { %1308 = shalt.err (!%p1305_p8)
}
 0x66e   : > { %1118 = dma.vmem_to_hbm [thread:$0]  (%p1516_p10), %s1687_s14, 128, %s1685_s24, %s901_s21  }
 0x66f PF: > { %s927_s27 = sand.u32 1, %s1347_s18   ;;  %p1758_p12 = scmp.ne.s32.totalorder %s1748_s29, 0 }
 0x670   : > { %p1759_p11 = scmp.ge.s32.totalorder %s1367_s23, 2  ;;  %s928_s16 = scalar_lea.sflag [#allocation7], %s927_s27 }
 0x672   : > { %p1129_p0 = pnand %p1759_p11, %p1758_p12 }
 0x674   : > { %1342 = dma.done.wait (!%p1129_p0), %s928_s16, 128  }
 0x675   : > { %1344 = vsyncadd (!%p1129_p0), %s928_s16, 4294967168  ;;  %s22_s23 = sadd.s32 1, %s1367_s23   ;;  %s1760_s18 = smov %s1351_s19 }
 0x676   : > { %p19_p5 = scmp.ge.s32.totalorder %s22_s23, 4   ;;  %s1761_s19 = smov %s1355_s20 }
 0x677   : > { %s1762_s20 = smov %s1525_s15  ;;  %s1763_s21 = smov %s1363_s22 }
 0x678   : > { %s1764_s22 = smov %s1766_s9  ;;  %21 = sbr.rel (!%p19_p5) target bundleno = 7 (0x7), region = 102 }
 0x67f   :  { %933 = vsyncpa [#allocation6], 1 }
 0x680   :  { %935 = vsyncpa [#allocation6 + $0x1], 1 }
 0x681   :  { %936 = vsyncpa [#allocation9], 1 }
 0x682   :  { %937 = vsyncpa [#allocation7], 1 }
 0x683   :  { %939 = vsyncpa [#allocation7 + $0x1], 1 }

</bundles_post_ra>
